<compile_context>
chip_gen: v7x
topology: tpu7x:2x2x1
jax: 0.10.0
libtpu: 0.0.40
codegen_flags: <defaults>
</compile_context>

<pallas_src>
import math
import functools

import jax
import jax.numpy as jnp
from jax import lax
from jax.experimental import pallas as pl
from jax.experimental.pallas import tpu as pltpu


# ------------------------- generation-aware sizing -------------------------
def _vmem_capacity_bytes():
    try:
        return int(pltpu.get_tpu_info().vmem_capacity_bytes)
    except Exception:
        return 64 * 1024 * 1024      # conservative: assume v7x-sized VMEM

_BIG_VMEM = _vmem_capacity_bytes() >= 96 * 1024 * 1024   # v5e/v6e: 128 MiB, v7x: 64 MiB
_MM_TM_TARGET = 512 if _BIG_VMEM else 256                 # ~85% HBM roofline at 512 tiles
_MM_TN_TARGET = 512 if _BIG_VMEM else 256
_MM_TK_TARGET = 512
_VMEM_LIMIT = (64 if _BIG_VMEM else 32) * 1024 * 1024


def _pick_tile(dim, target, align):
    """Largest tile <= target that divides dim and is a multiple of `align`
    (falls back to the full dim, which is always a legal block size)."""
    if dim <= target:
        return dim
    t = (target // align) * align
    while t >= align:
        if dim % t == 0:
            return t
        t -= align
    return dim


def _weight_spec(tk, tn, index_map, k_steps):
    # Deeper buffering on the streamed weight operand only when the K loop is long
    # enough for a third buffer to hide exposed DMA latency.
    if k_steps >= 3:
        return pl.BlockSpec((tk, tn), index_map, pipeline_mode=pl.Buffered(3))
    return pl.BlockSpec((tk, tn), index_map)


# --------- Fused Q/K/V projection: three (M,K)@(K,N)+b in one pallas_call ---------
def _qkv_proj_kernel(xq_ref, xk_ref, xv_ref, wq_ref, wk_ref, wv_ref,
                     bq_ref, bk_ref, bv_ref, oq_ref, ok_ref, ov_ref,
                     accq, acck, accv):
    @pl.when(pl.program_id(2) == 0)
    def _():
        accq[...] = jnp.zeros_like(accq)
        acck[...] = jnp.zeros_like(acck)
        accv[...] = jnp.zeros_like(accv)

    accq[...] += jnp.dot(xq_ref[...], wq_ref[...], preferred_element_type=jnp.float32)
    acck[...] += jnp.dot(xk_ref[...], wk_ref[...], preferred_element_type=jnp.float32)
    accv[...] += jnp.dot(xv_ref[...], wv_ref[...], preferred_element_type=jnp.float32)

    @pl.when(pl.program_id(2) == pl.num_programs(2) - 1)
    def _():
        oq_ref[...] = (accq[...] + bq_ref[...]).astype(oq_ref.dtype)
        ok_ref[...] = (acck[...] + bk_ref[...]).astype(ok_ref.dtype)
        ov_ref[...] = (accv[...] + bv_ref[...]).astype(ov_ref.dtype)


def qkv_projection(xq, xk, xv, wq, wk, wv, bq, bk, bv):
    """xq/xk/xv: (M, K); weights (K, N); biases (N,). Returns (q, k, v) each (M, N).
    No (3, M, D) HBM stacking of activations — each operand is its own pipelined input."""
    M, K = xq.shape
    N = wq.shape[1]
    tm = _pick_tile(M, _MM_TM_TARGET, 8)
    tn = _pick_tile(N, _MM_TN_TARGET, 128)
    tk = _pick_tile(K, _MM_TK_TARGET, 128)
    k_steps = K // tk
    grid = (M // tm, N // tn, k_steps)

    x_spec = pl.BlockSpec((tm, tk), lambda i, j, k: (i, k))
    w_spec = _weight_spec(tk, tn, lambda i, j, k: (k, j), k_steps)
    b_spec = pl.BlockSpec((1, tn), lambda i, j, k: (0, j))
    o_spec = pl.BlockSpec((tm, tn), lambda i, j, k: (i, j))

    itemsize = xq.dtype.itemsize
    cost = pl.CostEstimate(
        flops=3 * 2 * M * N * K,
        transcendentals=0,
        bytes_accessed=int(3 * (M * K + K * N + N + M * N) * itemsize),
    )

    out_sds = jax.ShapeDtypeStruct((M, N), xq.dtype)
    return pl.pallas_call(
        _qkv_proj_kernel,
        out_shape=(out_sds, out_sds, out_sds),
        grid_spec=pltpu.PrefetchScalarGridSpec(
            num_scalar_prefetch=0,
            grid=grid,
            in_specs=[x_spec, x_spec, x_spec, w_spec, w_spec, w_spec,
                      b_spec, b_spec, b_spec],
            out_specs=(o_spec, o_spec, o_spec),
            scratch_shapes=[pltpu.VMEM((tm, tn), jnp.float32)] * 3,
        ),
        compiler_params=pltpu.CompilerParams(
            dimension_semantics=("parallel", "parallel", "arbitrary"),
            vmem_limit_bytes=_VMEM_LIMIT,
        ),
        cost_estimate=cost,
    )(xq, xk, xv, wq, wk, wv,
      bq.reshape(1, N), bk.reshape(1, N), bv.reshape(1, N))


# ------------------------- Output projection: y = x @ W + b -------------------------
def _linear_kernel(x_ref, w_ref, b_ref, o_ref, acc_ref):
    @pl.when(pl.program_id(2) == 0)
    def _():
        acc_ref[...] = jnp.zeros_like(acc_ref)

    acc_ref[...] += jnp.dot(x_ref[...], w_ref[...], preferred_element_type=jnp.float32)

    @pl.when(pl.program_id(2) == pl.num_programs(2) - 1)
    def _():
        o_ref[...] = (acc_ref[...] + b_ref[...]).astype(o_ref.dtype)


def linear(x, w, b):
    M, K = x.shape
    N = w.shape[1]
    tm = _pick_tile(M, _MM_TM_TARGET, 8)
    tn = _pick_tile(N, _MM_TN_TARGET, 128)
    tk = _pick_tile(K, _MM_TK_TARGET, 128)
    k_steps = K // tk
    grid = (M // tm, N // tn, k_steps)

    cost = pl.CostEstimate(
        flops=2 * M * N * K,
        transcendentals=0,
        bytes_accessed=int((M * K + K * N + N + M * N) * x.dtype.itemsize),
    )

    return pl.pallas_call(
        _linear_kernel,
        out_shape=jax.ShapeDtypeStruct((M, N), x.dtype),
        grid_spec=pltpu.PrefetchScalarGridSpec(
            num_scalar_prefetch=0,
            grid=grid,
            in_specs=[pl.BlockSpec((tm, tk), lambda i, j, k: (i, k)),
                      _weight_spec(tk, tn, lambda i, j, k: (k, j), k_steps),
                      pl.BlockSpec((1, tn), lambda i, j, k: (0, j))],
            out_specs=pl.BlockSpec((tm, tn), lambda i, j, k: (i, j)),
            scratch_shapes=[pltpu.VMEM((tm, tn), jnp.float32)],
        ),
        compiler_params=pltpu.CompilerParams(
            dimension_semantics=("parallel", "parallel", "arbitrary"),
            vmem_limit_bytes=_VMEM_LIMIT,
        ),
        cost_estimate=cost,
    )(x, w, b.reshape(1, N))


# --------- Attention kernel: query-tiled, heads handled inside one lane-dense block ---------
def _attn_kernel(q_ref, k_ref, v_ref, o_ref, *, num_heads, scale):
    # q/o blocks: (1, tq, D); k/v blocks: (1, S, D). D = num_heads * Dh on the lane axis.
    _, tq, D = q_ref.shape
    Dh = D // num_heads
    # Fold the softmax scale into q once: O(tq*D) multiplies instead of an O(tq*S)
    # pass over every head's score matrix.
    q = q_ref[0] * scale
    k = k_ref[0]
    v = v_ref[0]

    # Per-head loop with per-head stores: bounds live ranges (no num_heads live (tq,S)
    # score tiles) and removes the trailing lane-interleaving concatenate.
    # TODO(synk): optional attention mask (masked_fill -inf) not wired; forward uses mask=None.
    for h in range(num_heads):
        lo = h * Dh
        qh = q[:, lo:lo + Dh]
        kh = k[:, lo:lo + Dh]
        vh = v[:, lo:lo + Dh]
        # q @ k^T via dot_general contracting the last dims (no explicit transpose).
        s = lax.dot_general(qh, kh, (((1,), (1,)), ((), ())),
                            preferred_element_type=jnp.float32)            # (tq, S) f32
        m = jnp.max(s, axis=-1, keepdims=True)
        p = jnp.exp(s - m)
        denom = jnp.sum(p, axis=-1, keepdims=True)
        # Dropout is identity at inference.
        ctx = jnp.dot(p.astype(vh.dtype), vh, preferred_element_type=jnp.float32)
        # Normalize after the PV matmul: O(tq*Dh) multiplies instead of O(tq*S).
        # Exact reciprocal keeps the 1e-4 validation tolerance (approx=True uses EUP vrcp).
        o_ref[0, :, lo:lo + Dh] = (
            ctx * pl.reciprocal(denom, approx=False)).astype(o_ref.dtype)


def attention(q, k, v, num_heads, *, tq_target=256):
    """q, k, v: (B, S, D) post-projection activations; heads split inside the kernel."""
    B, S, D = q.shape
    Dh = D // num_heads
    scale = 1.0 / math.sqrt(Dh)
    # Query-tile grid axis: per-step VMEM is (1,tq,D) q/o + (1,S,D) k/v + a (tq,S) score
    # tile, and the grid has B * S/tq fully parallel steps for megacore sharding.
    tq = _pick_tile(S, tq_target, 8)
    grid = (B, S // tq)

    q_spec = pl.BlockSpec((1, tq, D), lambda b, i: (b, i, 0))
    kv_spec = pl.BlockSpec((1, S, D), lambda b, i: (b, 0, 0))

    cost = pl.CostEstimate(
        flops=4 * B * num_heads * S * S * Dh,
        transcendentals=B * num_heads * S * S,
        bytes_accessed=int(4 * B * S * D * q.dtype.itemsize),
    )

    # TODO(synk): for very long S, add a KV grid axis with online softmax (flash pattern)
    # so the (tq, S) score tile and full-S K/V blocks never have to fit in VMEM.
    return pl.pallas_call(
        functools.partial(_attn_kernel, num_heads=num_heads, scale=scale),
        out_shape=jax.ShapeDtypeStruct((B, S, D), q.dtype),
        grid=grid,
        in_specs=[q_spec, kv_spec, kv_spec],
        out_specs=q_spec,
        compiler_params=pltpu.CompilerParams(
            dimension_semantics=("parallel", "parallel"),
            vmem_limit_bytes=_VMEM_LIMIT,
        ),
        cost_estimate=cost,
    )(q, k, v)


# ---------------- Full MultiHeadAttention forward ----------------
def mha_forward(k, q, v, params, num_heads):
    B, S, D = q.shape
    M = B * S

    # Fused Q/K/V projections (single pallas_call, no activation stacking in HBM).
    q_p, k_p, v_p = qkv_projection(
        q.reshape(M, D), k.reshape(M, D), v.reshape(M, D),
        params["wq"], params["wk"], params["wv"],
        params["bq"], params["bk"], params["bv"])

    # Attention keeps the (B, S, D) layout: no host-side split/merge-head transposes.
    ctx = attention(q_p.reshape(B, S, D), k_p.reshape(B, S, D),
                    v_p.reshape(B, S, D), num_heads)

    # TODO(synk): for tiny latency-bound shapes, fuse attention + w_o into one pallas_call.
    out = linear(ctx.reshape(M, D), params["wo"], params["bo"])
    return out.reshape(B, S, D)


# ---------------- Pure-JAX reference for validation ----------------
def mha_reference(k, q, v, params, num_heads):
    B, S, D = q.shape
    Dh = D // num_heads
    kp = k @ params["wk"] + params["bk"]
    qp = q @ params["wq"] + params["bq"]
    vp = v @ params["wv"] + params["bv"]
    sh = lambda x: x.reshape(B, S, num_heads, Dh).transpose(0, 2, 1, 3)
    kh, qh, vh = sh(kp), sh(qp), sh(vp)
    scores = (qh @ jnp.swapaxes(kh, -2, -1)) / math.sqrt(Dh)
    attn = jax.nn.softmax(scores, axis=-1)
    ctx = (attn @ vh).transpose(0, 2, 1, 3).reshape(B, S, D)
    return ctx @ params["wo"] + params["bo"]


if __name__ == "__main__":
    B, S = 2, 8
    d_model, num_heads = 128, 8   # small d_model; d_model % num_heads == 0

    key = jax.random.PRNGKey(0)
    keys = jax.random.split(key, 11)
    bound = 1.0 / math.sqrt(d_model)   # PyTorch nn.Linear default init range

    def init_linear(kw, kb):
        w = jax.random.uniform(kw, (d_model, d_model), jnp.float32, -bound, bound)  # (in, out)
        b = jax.random.uniform(kb, (d_model,), jnp.float32, -bound, bound)
        return w, b

    wq, bq = init_linear(keys[0], keys[1])
    wk, bk = init_linear(keys[2], keys[3])
    wv, bv = init_linear(keys[4], keys[5])
    wo, bo = init_linear(keys[6], keys[7])
    params = dict(wq=wq, bq=bq, wk=wk, bk=bk, wv=wv, bv=bv, wo=wo, bo=bo)

    k_in = jax.random.normal(keys[8], (B, S, d_model), jnp.float32)
    q_in = jax.random.normal(keys[9], (B, S, d_model), jnp.float32)
    v_in = jax.random.normal(keys[10], (B, S, d_model), jnp.float32)

    out = mha_forward(k_in, q_in, v_in, params, num_heads)
    out = jax.block_until_ready(out)

    ref = mha_reference(k_in, q_in, v_in, params, num_heads)
    assert out.shape == (B, S, d_model)
    assert jnp.allclose(out, ref, atol=1e-4, rtol=1e-4), "mismatch vs reference"

    print("KERNEL_OK")
</pallas_src>

<mosaic_0001>
module attributes {stable_mosaic.version = 11 : i64} {
  func.func @_qkv_proj_kernel(%arg0: i32, %arg1: i32, %arg2: i32, %arg3: memref<16x128xf32, #tpu.memory_space<vmem>>, %arg4: memref<16x128xf32, #tpu.memory_space<vmem>>, %arg5: memref<16x128xf32, #tpu.memory_space<vmem>>, %arg6: memref<128x128xf32, #tpu.memory_space<vmem>>, %arg7: memref<128x128xf32, #tpu.memory_space<vmem>>, %arg8: memref<128x128xf32, #tpu.memory_space<vmem>>, %arg9: memref<1x128xf32, #tpu.memory_space<vmem>>, %arg10: memref<1x128xf32, #tpu.memory_space<vmem>>, %arg11: memref<1x128xf32, #tpu.memory_space<vmem>>, %arg12: memref<16x128xf32, #tpu.memory_space<vmem>>, %arg13: memref<16x128xf32, #tpu.memory_space<vmem>>, %arg14: memref<16x128xf32, #tpu.memory_space<vmem>>, %arg15: memref<16x128xf32, #tpu.memory_space<vmem>>, %arg16: memref<16x128xf32, #tpu.memory_space<vmem>>, %arg17: memref<16x128xf32, #tpu.memory_space<vmem>>) attributes {dimension_semantics = [#tpu.dimension_semantics<parallel>, #tpu.dimension_semantics<parallel>, #tpu.dimension_semantics<arbitrary>], iteration_bounds = array<i64: 1, 1, 1>, scalar_prefetch = 0 : i64, scratch_operands = 3 : i64, tpu.core_type = #tpu.core_type<tc>, window_params = [{transform_indices = @transform_0, window_bounds = array<i64: 16, 128>}, {transform_indices = @transform_1, window_bounds = array<i64: 16, 128>}, {transform_indices = @transform_2, window_bounds = array<i64: 16, 128>}, {transform_indices = @transform_3, window_bounds = array<i64: 128, 128>}, {transform_indices = @transform_4, window_bounds = array<i64: 128, 128>}, {transform_indices = @transform_5, window_bounds = array<i64: 128, 128>}, {transform_indices = @transform_6, window_bounds = array<i64: 1, 128>}, {transform_indices = @transform_7, window_bounds = array<i64: 1, 128>}, {transform_indices = @transform_8, window_bounds = array<i64: 1, 128>}, {transform_indices = @transform_9, window_bounds = array<i64: 16, 128>}, {transform_indices = @transform_10, window_bounds = array<i64: 16, 128>}, {transform_indices = @transform_11, window_bounds = array<i64: 16, 128>}]} {
    %c0_i32 = arith.constant 0 : i32
    %0 = arith.cmpi eq, %arg2, %c0_i32 : i32
    %1 = arith.extui %0 : i1 to i32
    %c0_i32_0 = arith.constant 0 : i32
    %2 = arith.cmpi ne, %1, %c0_i32_0 : i32
    scf.if %2 {
      %cst_28 = arith.constant 0.000000e+00 : f32
      %24 = vector.broadcast %cst_28 : f32 to vector<16x128xf32>
      %c0_29 = arith.constant 0 : index
      %c0_30 = arith.constant 0 : index
      %25 = vector.load %arg15[%c0_29, %c0_30] : memref<16x128xf32, #tpu.memory_space<vmem>>, vector<16x128xf32>
      tpu.vector_store %arg15[%c0_29, %c0_30], %24 {strides = array<i32>} : memref<16x128xf32, #tpu.memory_space<vmem>>, vector<16x128xf32>,
      %cst_31 = arith.constant 0.000000e+00 : f32
      %26 = vector.broadcast %cst_31 : f32 to vector<16x128xf32>
      %c0_32 = arith.constant 0 : index
      %c0_33 = arith.constant 0 : index
      %27 = vector.load %arg16[%c0_32, %c0_33] : memref<16x128xf32, #tpu.memory_space<vmem>>, vector<16x128xf32>
      tpu.vector_store %arg16[%c0_32, %c0_33], %26 {strides = array<i32>} : memref<16x128xf32, #tpu.memory_space<vmem>>, vector<16x128xf32>,
      %cst_34 = arith.constant 0.000000e+00 : f32
      %28 = vector.broadcast %cst_34 : f32 to vector<16x128xf32>
      %c0_35 = arith.constant 0 : index
      %c0_36 = arith.constant 0 : index
      %29 = vector.load %arg17[%c0_35, %c0_36] : memref<16x128xf32, #tpu.memory_space<vmem>>, vector<16x128xf32>
      tpu.vector_store %arg17[%c0_35, %c0_36], %28 {strides = array<i32>} : memref<16x128xf32, #tpu.memory_space<vmem>>, vector<16x128xf32>,
    } else {
    }
    %c0 = arith.constant 0 : index
    %c0_1 = arith.constant 0 : index
    %3 = vector.load %arg15[%c0, %c0_1] : memref<16x128xf32, #tpu.memory_space<vmem>>, vector<16x128xf32>
    %c0_2 = arith.constant 0 : index
    %c0_3 = arith.constant 0 : index
    %4 = vector.load %arg3[%c0_2, %c0_3] : memref<16x128xf32, #tpu.memory_space<vmem>>, vector<16x128xf32>
    %c0_4 = arith.constant 0 : index
    %c0_5 = arith.constant 0 : index
    %5 = vector.load %arg6[%c0_4, %c0_5] : memref<128x128xf32, #tpu.memory_space<vmem>>, vector<128x128xf32>
    %cst = arith.constant dense<0.000000e+00> : vector<16x128xf32>
    %6 = tpu.matmul %4, %5, %cst {dimension_numbers = #tpu.dot_dimension_numbers<[1], [0], [0], [1], [0, 0, 1, 1], [], []>} : vector<16x128xf32>, vector<128x128xf32>, vector<16x128xf32> -> vector<16x128xf32>
    %7 = arith.addf %3, %6 : vector<16x128xf32>
    %c0_6 = arith.constant 0 : index
    %c0_7 = arith.constant 0 : index
    %8 = vector.load %arg15[%c0_6, %c0_7] : memref<16x128xf32, #tpu.memory_space<vmem>>, vector<16x128xf32>
    tpu.vector_store %arg15[%c0_6, %c0_7], %7 {strides = array<i32>} : memref<16x128xf32, #tpu.memory_space<vmem>>, vector<16x128xf32>,
    %c0_8 = arith.constant 0 : index
    %c0_9 = arith.constant 0 : index
    %9 = vector.load %arg16[%c0_8, %c0_9] : memref<16x128xf32, #tpu.memory_space<vmem>>, vector<16x128xf32>
    %c0_10 = arith.constant 0 : index
    %c0_11 = arith.constant 0 : index
    %10 = vector.load %arg4[%c0_10, %c0_11] : memref<16x128xf32, #tpu.memory_space<vmem>>, vector<16x128xf32>
    %c0_12 = arith.constant 0 : index
    %c0_13 = arith.constant 0 : index
    %11 = vector.load %arg7[%c0_12, %c0_13] : memref<128x128xf32, #tpu.memory_space<vmem>>, vector<128x128xf32>
    %cst_14 = arith.constant dense<0.000000e+00> : vector<16x128xf32>
    %12 = tpu.matmul %10, %11, %cst_14 {dimension_numbers = #tpu.dot_dimension_numbers<[1], [0], [0], [1], [0, 0, 1, 1], [], []>} : vector<16x128xf32>, vector<128x128xf32>, vector<16x128xf32> -> vector<16x128xf32>
    %13 = arith.addf %9, %12 : vector<16x128xf32>
    %c0_15 = arith.constant 0 : index
    %c0_16 = arith.constant 0 : index
    %14 = vector.load %arg16[%c0_15, %c0_16] : memref<16x128xf32, #tpu.memory_space<vmem>>, vector<16x128xf32>
    tpu.vector_store %arg16[%c0_15, %c0_16], %13 {strides = array<i32>} : memref<16x128xf32, #tpu.memory_space<vmem>>, vector<16x128xf32>,
    %c0_17 = arith.constant 0 : index
    %c0_18 = arith.constant 0 : index
    %15 = vector.load %arg17[%c0_17, %c0_18] : memref<16x128xf32, #tpu.memory_space<vmem>>, vector<16x128xf32>
    %c0_19 = arith.constant 0 : index
    %c0_20 = arith.constant 0 : index
    %16 = vector.load %arg5[%c0_19, %c0_20] : memref<16x128xf32, #tpu.memory_space<vmem>>, vector<16x128xf32>
    %c0_21 = arith.constant 0 : index
    %c0_22 = arith.constant 0 : index
    %17 = vector.load %arg8[%c0_21, %c0_22] : memref<128x128xf32, #tpu.memory_space<vmem>>, vector<128x128xf32>
    %cst_23 = arith.constant dense<0.000000e+00> : vector<16x128xf32>
    %18 = tpu.matmul %16, %17, %cst_23 {dimension_numbers = #tpu.dot_dimension_numbers<[1], [0], [0], [1], [0, 0, 1, 1], [], []>} : vector<16x128xf32>, vector<128x128xf32>, vector<16x128xf32> -> vector<16x128xf32>
    %19 = arith.addf %15, %18 : vector<16x128xf32>
    %c0_24 = arith.constant 0 : index
    %c0_25 = arith.constant 0 : index
    %20 = vector.load %arg17[%c0_24, %c0_25] : memref<16x128xf32, #tpu.memory_space<vmem>>, vector<16x128xf32>
    tpu.vector_store %arg17[%c0_24, %c0_25], %19 {strides = array<i32>} : memref<16x128xf32, #tpu.memory_space<vmem>>, vector<16x128xf32>,
    %c0_i32_26 = arith.constant 0 : i32
    %21 = arith.cmpi eq, %arg2, %c0_i32_26 : i32
    %22 = arith.extui %21 : i1 to i32
    %c0_i32_27 = arith.constant 0 : i32
    %23 = arith.cmpi ne, %22, %c0_i32_27 : i32
    scf.if %23 {
      %c0_28 = arith.constant 0 : index
      %c0_29 = arith.constant 0 : index
      %24 = vector.load %arg15[%c0_28, %c0_29] : memref<16x128xf32, #tpu.memory_space<vmem>>, vector<16x128xf32>
      %c0_30 = arith.constant 0 : index
      %c0_31 = arith.constant 0 : index
      %25 = vector.load %arg9[%c0_30, %c0_31] : memref<1x128xf32, #tpu.memory_space<vmem>>, vector<1x128xf32>
      %26 = vector.broadcast %25 : vector<1x128xf32> to vector<16x128xf32>
      %27 = arith.addf %24, %26 : vector<16x128xf32>
      %c0_32 = arith.constant 0 : index
      %c0_33 = arith.constant 0 : index
      %28 = vector.load %arg12[%c0_32, %c0_33] : memref<16x128xf32, #tpu.memory_space<vmem>>, vector<16x128xf32>
      tpu.vector_store %arg12[%c0_32, %c0_33], %27 {strides = array<i32>} : memref<16x128xf32, #tpu.memory_space<vmem>>, vector<16x128xf32>,
      %c0_34 = arith.constant 0 : index
      %c0_35 = arith.constant 0 : index
      %29 = vector.load %arg16[%c0_34, %c0_35] : memref<16x128xf32, #tpu.memory_space<vmem>>, vector<16x128xf32>
      %c0_36 = arith.constant 0 : index
      %c0_37 = arith.constant 0 : index
      %30 = vector.load %arg10[%c0_36, %c0_37] : memref<1x128xf32, #tpu.memory_space<vmem>>, vector<1x128xf32>
      %31 = vector.broadcast %30 : vector<1x128xf32> to vector<16x128xf32>
      %32 = arith.addf %29, %31 : vector<16x128xf32>
      %c0_38 = arith.constant 0 : index
      %c0_39 = arith.constant 0 : index
      %33 = vector.load %arg13[%c0_38, %c0_39] : memref<16x128xf32, #tpu.memory_space<vmem>>, vector<16x128xf32>
      tpu.vector_store %arg13[%c0_38, %c0_39], %32 {strides = array<i32>} : memref<16x128xf32, #tpu.memory_space<vmem>>, vector<16x128xf32>,
      %c0_40 = arith.constant 0 : index
      %c0_41 = arith.constant 0 : index
      %34 = vector.load %arg17[%c0_40, %c0_41] : memref<16x128xf32, #tpu.memory_space<vmem>>, vector<16x128xf32>
      %c0_42 = arith.constant 0 : index
      %c0_43 = arith.constant 0 : index
      %35 = vector.load %arg11[%c0_42, %c0_43] : memref<1x128xf32, #tpu.memory_space<vmem>>, vector<1x128xf32>
      %36 = vector.broadcast %35 : vector<1x128xf32> to vector<16x128xf32>
      %37 = arith.addf %34, %36 : vector<16x128xf32>
      %c0_44 = arith.constant 0 : index
      %c0_45 = arith.constant 0 : index
      %38 = vector.load %arg14[%c0_44, %c0_45] : memref<16x128xf32, #tpu.memory_space<vmem>>, vector<16x128xf32>
      tpu.vector_store %arg14[%c0_44, %c0_45], %37 {strides = array<i32>} : memref<16x128xf32, #tpu.memory_space<vmem>>, vector<16x128xf32>,
    } else {
    }
    return
  }
  func.func @transform_0(%arg0: i32, %arg1: i32, %arg2: i32) -> (i32, i32) {
    %c0_i32 = arith.constant 0 : i32
    return %arg0, %arg2 : i32, i32
  }
  func.func @transform_1(%arg0: i32, %arg1: i32, %arg2: i32) -> (i32, i32) {
    %c0_i32 = arith.constant 0 : i32
    return %arg0, %arg2 : i32, i32
  }
  func.func @transform_2(%arg0: i32, %arg1: i32, %arg2: i32) -> (i32, i32) {
    %c0_i32 = arith.constant 0 : i32
    return %arg0, %arg2 : i32, i32
  }
  func.func @transform_3(%arg0: i32, %arg1: i32, %arg2: i32) -> (i32, i32) {
    %c0_i32 = arith.constant 0 : i32
    return %arg2, %arg1 : i32, i32
  }
  func.func @transform_4(%arg0: i32, %arg1: i32, %arg2: i32) -> (i32, i32) {
    %c0_i32 = arith.constant 0 : i32
    return %arg2, %arg1 : i32, i32
  }
  func.func @transform_5(%arg0: i32, %arg1: i32, %arg2: i32) -> (i32, i32) {
    %c0_i32 = arith.constant 0 : i32
    return %arg2, %arg1 : i32, i32
  }
  func.func @transform_6(%arg0: i32, %arg1: i32, %arg2: i32) -> (i32, i32) {
    %c0_i32 = arith.constant 0 : i32
    %c0_i32_0 = arith.constant 0 : i32
    return %c0_i32, %arg1 : i32, i32
  }
  func.func @transform_7(%arg0: i32, %arg1: i32, %arg2: i32) -> (i32, i32) {
    %c0_i32 = arith.constant 0 : i32
    %c0_i32_0 = arith.constant 0 : i32
    return %c0_i32, %arg1 : i32, i32
  }
  func.func @transform_8(%arg0: i32, %arg1: i32, %arg2: i32) -> (i32, i32) {
    %c0_i32 = arith.constant 0 : i32
    %c0_i32_0 = arith.constant 0 : i32
    return %c0_i32, %arg1 : i32, i32
  }
  func.func @transform_9(%arg0: i32, %arg1: i32, %arg2: i32) -> (i32, i32) {
    %c0_i32 = arith.constant 0 : i32
    return %arg0, %arg1 : i32, i32
  }
  func.func @transform_10(%arg0: i32, %arg1: i32, %arg2: i32) -> (i32, i32) {
    %c0_i32 = arith.constant 0 : i32
    return %arg0, %arg1 : i32, i32
  }
  func.func @transform_11(%arg0: i32, %arg1: i32, %arg2: i32) -> (i32, i32) {
    %c0_i32 = arith.constant 0 : i32
    return %arg0, %arg1 : i32, i32
  }
}

</mosaic_0001>

<bundles_post_ra>
// kernel: tpu_custom_call.1
= control target key start
LH: loop header
LB: loop body
LE: loop exit
PB: predicated region body
PF: predicated region fallthrough
CT: control target
= control target key end

     0   :  { %17 = vsyncpa [#allocation6], 0  ;;  %s1234_s0 = inlined_call_operand.hbm [shape: f32[16,128], index: 0, kind: input, shape index: {}]   ;;  %s1235_s1 = inlined_call_operand.hbm [shape: f32[16,128], index: 1, kind: input, shape index: {}]   ;;  %s1236_s2 = inlined_call_operand.hbm [shape: f32[16,128], index: 2, kind: input, shape index: {}]   ;;  %s1237_s3 = inlined_call_operand.hbm [shape: f32[128,128], index: 3, kind: input, shape index: {}]   ;;  %s1238_s4 = inlined_call_operand.hbm [shape: f32[128,128], index: 4, kind: input, shape index: {}]   ;;  %s1239_s5 = inlined_call_operand.hbm [shape: f32[128,128], index: 5, kind: input, shape index: {}]   ;;  %s1240_s6 = inlined_call_operand.vmem [shape: f32[1,128], index: 6, kind: input, shape index: {}]   ;;  %s1241_s7 = inlined_call_operand.vmem [shape: f32[1,128], index: 7, kind: input, shape index: {}]   ;;  %s1242_s8 = inlined_call_operand.vmem [shape: f32[1,128], index: 8, kind: input, shape index: {}]   ;;  %s1243_s9 = inlined_call_operand.hbm [shape: f32[16,128], index: 9, kind: output, shape index: {0}]   ;;  %s1244_s10 = inlined_call_operand.hbm [shape: f32[16,128], index: 10, kind: output, shape index: {1}]   ;;  %s1245_s11 = inlined_call_operand.hbm [shape: f32[16,128], index: 11, kind: output, shape index: {2}]  }
   0x1   :  { %18 = vsyncpa [#allocation9], 0 }
   0x2   :  { %19 = vsyncpa [#allocation12], 0 }
   0x3   :  { %20 = vsyncpa [#allocation15], 0 }
   0x4   :  { %21 = vsyncpa [#allocation7], 0 }
   0x5   :  { %22 = vsyncpa [#allocation18], 0  ;;  %s998_s17 = smov [#allocation8]   ;;  %s999_s19 = smov [#allocation11]  }
   0x6   :  { %s40_s18 = sshll.u32 %s998_s17, 4  ;;  %s64_s20 = sshll.u32 %s999_s19, 4  ;;  %s41_s18 = int_to_ptr.vmem [resolvable:$true] %s40_s18  ;;  %s1069_s20 = int_to_ptr.vmem [resolvable:$true] %s64_s20 }
   0x7   :  { %s788_s23 = scalar_lea.hbm %s1235_s1, 256 }
   0x8   :  { %p789_p0 = scmp.ne.s32.totalorder %s1235_s1, %s788_s23  ;;  %p792_p1 = scmp.lt.u32.totalorder %s788_s23, %s1235_s1 }
   0xa   :  { %p794_p2 = pnand %p792_p1, %p789_p0 }
   0xc   :  { %797 = shalt.err (!%p794_p2)
}
   0xd   :  { %s798_s28 = scalar_lea.vmem %s41_s18, 256  ;;  %p803_p4 = scmp.lt.s32.totalorder %s41_s18, %s41_s18 }
   0xe   :  { %p799_p3 = scmp.ne.s32.totalorder %s41_s18, %s798_s28  ;;  %p804_p5 = scmp.lt.s32.totalorder %s798_s28, %s798_s28 }
  0x10   :  { %p805_p6 = por %p804_p5, %p803_p4 }
  0x12   :  { %p806_p7 = pnand %p805_p6, %p799_p3 }
  0x14   :  { %809 = shalt.err (!%p806_p7)
}
  0x15   :  { %s1000_s29 = smov 128   ;;  %s1001_s30 = smov 8  }
  0x16   :  { %46 = dma.hbm_to_vmem [thread:$0]  %s1235_s1, 256, %s41_s18, [#allocation9], %s1000_s29, %s1000_s29, %s1001_s30  }
  0x17   :  { %s810_s16 = scalar_lea.hbm %s1237_s3, 2048 }
  0x18   :  { %p811_p8 = scmp.ne.s32.totalorder %s1237_s3, %s810_s16  ;;  %p814_p9 = scmp.lt.u32.totalorder %s810_s16, %s1237_s3 }
  0x1a   :  { %p816_p10 = pnand %p814_p9, %p811_p8 }
  0x1c   :  { %819 = shalt.err (!%p816_p10)
}
  0x1d   :  { %s820_s23 = scalar_lea.vmem %s1069_s20, 2048  ;;  %p825_p12 = scmp.lt.s32.totalorder %s1069_s20, %s1069_s20 }
  0x1e   :  { %p821_p11 = scmp.ne.s32.totalorder %s1069_s20, %s820_s23  ;;  %p826_p13 = scmp.lt.s32.totalorder %s820_s23, %s820_s23 }
  0x20   :  { %p827_p0 = por %p826_p13, %p825_p12 }
  0x22   :  { %p828_p1 = pnand %p827_p0, %p821_p11 }
  0x24   :  { %831 = shalt.err (!%p828_p1)
}
  0x25   :  { %70 = dma.hbm_to_vmem [thread:$0]  %s1237_s3, 2048, %s1069_s20, [#allocation12], %s1000_s29, %s1000_s29, %s1001_s30  }
  0x26   :  { %s1002_s24 = smov [#allocation5]   ;;  %s1003_s26 = smov [#allocation10]  }
  0x27   :  { %s28_s25 = sshll.u32 %s1002_s24, 4  ;;  %s52_s27 = sshll.u32 %s1003_s26, 4  ;;  %s29_s25 = int_to_ptr.vmem [resolvable:$true] %s28_s25  ;;  %s1106_s27 = int_to_ptr.vmem [resolvable:$true] %s52_s27 }
  0x28   :  { %s832_s13 = scalar_lea.hbm %s1234_s0, 256 }
  0x29   :  { %p833_p2 = scmp.ne.s32.totalorder %s1234_s0, %s832_s13  ;;  %p836_p3 = scmp.lt.u32.totalorder %s832_s13, %s1234_s0 }
  0x2b   :  { %p838_p4 = pnand %p836_p3, %p833_p2 }
  0x2d   :  { %841 = shalt.err (!%p838_p4)
}
  0x2e   :  { %s842_s3 = scalar_lea.vmem %s29_s25, 256  ;;  %p847_p6 = scmp.lt.s32.totalorder %s29_s25, %s29_s25 }
  0x2f   :  { %p843_p5 = scmp.ne.s32.totalorder %s29_s25, %s842_s3  ;;  %p848_p7 = scmp.lt.s32.totalorder %s842_s3, %s842_s3 }
  0x31   :  { %p849_p8 = por %p848_p7, %p847_p6 }
  0x33   :  { %p850_p9 = pnand %p849_p8, %p843_p5 }
  0x35   :  { %853 = shalt.err (!%p850_p9)
}
  0x36   :  { %34 = dma.hbm_to_vmem [thread:$0]  %s1234_s0, 256, %s29_s25, [#allocation6], %s1000_s29, %s1000_s29, %s1001_s30  }
  0x37   :  { %s854_s23 = scalar_lea.hbm %s1236_s2, 256 }
  0x38   :  { %p855_p10 = scmp.ne.s32.totalorder %s1236_s2, %s854_s23  ;;  %p858_p11 = scmp.lt.u32.totalorder %s854_s23, %s1236_s2 }
  0x3a   :  { %p860_p12 = pnand %p858_p11, %p855_p10 }
  0x3c   :  { %863 = shalt.err (!%p860_p12)
}
  0x3d   :  { %s864_s28 = scalar_lea.vmem %s1106_s27, 256  ;;  %p869_p0 = scmp.lt.s32.totalorder %s1106_s27, %s1106_s27 }
  0x3e   :  { %p865_p13 = scmp.ne.s32.totalorder %s1106_s27, %s864_s28  ;;  %p870_p1 = scmp.lt.s32.totalorder %s864_s28, %s864_s28 }
  0x40   :  { %p871_p2 = por %p870_p1, %p869_p0 }
  0x42   :  { %p872_p3 = pnand %p871_p2, %p865_p13 }
  0x44   :  { %875 = shalt.err (!%p872_p3)
}
  0x45   :  { %58 = dma.hbm_to_vmem [thread:$0]  %s1236_s2, 256, %s1106_s27, [#allocation9], %s1000_s29, %s1000_s29, %s1001_s30  }
  0x46   :  { %s1004_s12 = smov [#allocation13]   ;;  %s1005_s14 = smov [#allocation14]  }
  0x47   :  { %s76_s13 = sshll.u32 %s1004_s12, 4  ;;  %s88_s15 = sshll.u32 %s1005_s14, 4  ;;  %s77_s13 = int_to_ptr.vmem [resolvable:$true] %s76_s13  ;;  %s1143_s15 = int_to_ptr.vmem [resolvable:$true] %s88_s15 }
  0x48   :  { %s876_s3 = scalar_lea.hbm %s1238_s4, 2048 }
  0x49   :  { %p877_p4 = scmp.ne.s32.totalorder %s1238_s4, %s876_s3  ;;  %p880_p5 = scmp.lt.u32.totalorder %s876_s3, %s1238_s4 }
  0x4b   :  { %p882_p6 = pnand %p880_p5, %p877_p4 }
  0x4d   :  { %885 = shalt.err (!%p882_p6)
}
  0x4e   :  { %s886_s2 = scalar_lea.vmem %s77_s13, 2048  ;;  %p891_p8 = scmp.lt.s32.totalorder %s77_s13, %s77_s13 }
  0x4f   :  { %p887_p7 = scmp.ne.s32.totalorder %s77_s13, %s886_s2  ;;  %p892_p9 = scmp.lt.s32.totalorder %s886_s2, %s886_s2 }
  0x51   :  { %p893_p10 = por %p892_p9, %p891_p8 }
  0x53   :  { %p894_p11 = pnand %p893_p10, %p887_p7 }
  0x55   :  { %897 = shalt.err (!%p894_p11)
}
  0x56   :  { %82 = dma.hbm_to_vmem [thread:$0]  %s1238_s4, 2048, %s77_s13, [#allocation12], %s1000_s29, %s1000_s29, %s1001_s30  }
  0x57   :  { %s898_s24 = scalar_lea.hbm %s1239_s5, 2048 }
  0x58   :  { %p899_p12 = scmp.ne.s32.totalorder %s1239_s5, %s898_s24  ;;  %p902_p13 = scmp.lt.u32.totalorder %s898_s24, %s1239_s5 }
  0x5a   :  { %p904_p0 = pnand %p902_p13, %p899_p12 }
  0x5c   :  { %907 = shalt.err (!%p904_p0)
}
  0x5d   :  { %s908_s12 = scalar_lea.vmem %s1143_s15, 2048  ;;  %p913_p2 = scmp.lt.s32.totalorder %s1143_s15, %s1143_s15 }
  0x5e   :  { %p909_p1 = scmp.ne.s32.totalorder %s1143_s15, %s908_s12  ;;  %p914_p3 = scmp.lt.s32.totalorder %s908_s12, %s908_s12 }
  0x60   :  { %p915_p4 = por %p914_p3, %p913_p2 }
  0x62   :  { %p916_p5 = pnand %p915_p4, %p909_p1 }
  0x64   :  { %919 = shalt.err (!%p916_p5)
}
  0x65   :  { %94 = dma.hbm_to_vmem [thread:$0]  %s1239_s5, 2048, %s1143_s15, [#allocation15], %s1000_s29, %s1000_s29, %s1001_s30  }
  0x66   :  { %986 = dma.done.wait [#allocation6], 256  }
  0x67   :  { %987 = vsyncadd [#allocation6], 4294967040 }
  0x68   :  { %988 = dma.done.wait [#allocation9], 512  }
  0x69   :  { %989 = vsyncadd [#allocation9], 4294966784 }
  0x6a   :  { %990 = dma.done.wait [#allocation12], 4096  }
  0x6b   :  { %991 = vsyncadd [#allocation12], 4294963200 }
  0x6c   :  { %992 = dma.done.wait [#allocation15], 2048  }
  0x6d   :  { %993 = vsyncadd [#allocation15], 4294965248  ;;  %v133_v0 = vld [vmem:[#allocation11] sm:$0xff]  ;;  %v134_v1 = vld [vmem:[#allocation11 + $0x8] sm:$0xff]  ;;  %s1006_s15 = smov [#allocation16]   ;;  %s1007_s20 = smov [#allocation17]  }
  0x6e   :  { %v135_v2 = vld [vmem:[#allocation11 + $0x10] sm:$0xff]  ;;  %v681_v3 = vpack.c.bf16 %v134_v1, %v133_v0  ;;  %v136_v4 = vld [vmem:[#allocation11 + $0x18] sm:$0xff]  ;;  %v137_v6 = vld [vmem:[#allocation11 + $0x20] sm:$0xff]  ;;  %s473_s16 = sshll.u32 %s1006_s15, 4  ;;  %s485_s19 = sshll.u32 %s1007_s20, 4  ;;  %s474_s16 = int_to_ptr.vmem [resolvable:$true] %s473_s16  ;;  %s486_s19 = int_to_ptr.vmem [resolvable:$true] %s485_s19 }
  0x6f   :  { %v685_v5 = vpack.c.bf16 %v136_v4, %v135_v2  ;;  %v138_v7 = vld [vmem:[#allocation11 + $0x28] sm:$0xff]  ;;  %v232_v9 = vld [vmem:[#allocation13] sm:$0xff]  ;;  %v139_v11 = vld [vmem:[#allocation11 + $0x30] sm:$0xff]  ;;  %s920_s21 = scalar_lea.vmem %s474_s16, 256  ;;  %p925_p7 = scmp.lt.s32.totalorder %s474_s16, %s474_s16 }
  0x70   :  { %682 = vmatprep.subr.bf16.mxu0 %v681_v3  ;;  %v689_v8 = vpack.c.bf16 %v138_v7, %v137_v6  ;;  %v233_v10 = vld [vmem:[#allocation13 + $0x8] sm:$0xff]  ;;  %v140_v12 = vld [vmem:[#allocation11 + $0x38] sm:$0xff]  ;;  %v131_v14 = vld [vmem:[#allocation5] sm:$0xff]  ;;  %p921_p6 = scmp.ne.s32.totalorder %s474_s16, %s920_s21  ;;  %p926_p8 = scmp.lt.s32.totalorder %s920_s21, %s920_s21 }
  0x71   :  { %684 = vmatpush3.bf16.msra.mxu0 %v681_v3  ;;  %v713_v13 = vpack.c.bf16 %v233_v10, %v232_v9  ;;  %608 = vmatprep.mubr.f32.mxu0 %v131_v14  ;;  %v234_v15 = vld [vmem:[#allocation13 + $0x10] sm:$0xff]  ;;  %v235_v16 = vld [vmem:[#allocation13 + $0x18] sm:$0xff]  ;;  %v236_v18 = vld [vmem:[#allocation13 + $0x20] sm:$0xff]  ;;  %v693_v19 = vpack.c.bf16 %v140_v12, %v139_v11 }
  0x72   :  { %686 = vmatprep.subr.bf16.mxu0 %v685_v5  ;;  %v717_v17 = vpack.c.bf16 %v235_v16, %v234_v15  ;;  %v237_v20 = vld [vmem:[#allocation13 + $0x28] sm:$0xff]  ;;  %v141_v21 = vld [vmem:[#allocation11 + $0x40] sm:$0xff]  ;;  %v238_v24 = vld [vmem:[#allocation13 + $0x30] sm:$0xff]  ;;  %p927_p9 = por %p926_p8, %p925_p7 }
  0x73   :  { %714 = vmatprep.subr.bf16.mxu1 %v713_v13  ;;  %v142_v22 = vld [vmem:[#allocation11 + $0x48] sm:$0xff]  ;;  %v721_v23 = vpack.c.bf16 %v237_v20, %v236_v18  ;;  %v239_v25 = vld [vmem:[#allocation13 + $0x38] sm:$0xff]  ;;  %v143_v27 = vld [vmem:[#allocation11 + $0x50] sm:$0xff] }
  0x74   :  { %716 = vmatpush3.bf16.msra.mxu1 %v713_v13  ;;  %v697_v26 = vpack.c.bf16 %v142_v22, %v141_v21  ;;  %v144_v28 = vld [vmem:[#allocation11 + $0x58] sm:$0xff]  ;;  %v725_v29 = vpack.c.bf16 %v239_v25, %v238_v24  ;;  %v240_v30 = vld [vmem:[#allocation13 + $0x40] sm:$0xff]  ;;  %v241_v31 = vld [vmem:[#allocation13 + $0x48] sm:$0xff]  ;;  %p928_p10 = pnand %p927_p9, %p921_p6 }
  0x75   :  { %688 = vmatpush3.bf16.msra.mxu0 %v685_v5  ;;  %718 = vmatprep.subr.bf16.mxu1 %v717_v17  ;;  %v230_v32 = vld [vmem:[#allocation8] sm:$0xff]  ;;  %v701_v33 = vpack.c.bf16 %v144_v28, %v143_v27  ;;  %v146_v35 = vld [vmem:[#allocation11 + $0x68] sm:$0xff]  ;;  %v729_v36 = vpack.c.bf16 %v241_v31, %v240_v30  ;;  %v242_v37 = vld [vmem:[#allocation13 + $0x50] sm:$0xff] }
  0x76   :  { %690 = vmatprep.subr.bf16.mxu0 %v689_v8  ;;  %v145_v34 = vld [vmem:[#allocation11 + $0x60] sm:$0xff]  ;;  %643 = vmatprep.mubr.f32.mxu1 %v230_v32  ;;  %v243_v38 = vld [vmem:[#allocation13 + $0x58] sm:$0xff]  ;;  %v147_v40 = vld [vmem:[#allocation11 + $0x70] sm:$0xff] }
  0x77   :  { %v705_v39 = vpack.c.bf16 %v146_v35, %v145_v34  ;;  %v148_v41 = vld [vmem:[#allocation11 + $0x78] sm:$0xff]  ;;  %v733_v42 = vpack.c.bf16 %v243_v38, %v242_v37  ;;  %v244_v43 = vld [vmem:[#allocation13 + $0x60] sm:$0xff]  ;;  %v245_v44 = vld [vmem:[#allocation13 + $0x68] sm:$0xff] }
  0x78   :  { %720 = vmatpush3.bf16.msra.mxu1 %v717_v17  ;;  %v709_v45 = vpack.c.bf16 %v148_v41, %v147_v40  ;;  %v331_v46 = vld [vmem:[#allocation14] sm:$0xff]  ;;  %v332_v47 = vld [vmem:[#allocation14 + $0x8] sm:$0xff]  ;;  %v737_v48 = vpack.c.bf16 %v245_v44, %v244_v43  ;;  %v246_v49 = vld [vmem:[#allocation13 + $0x70] sm:$0xff] }
  0x79   :  { %692 = vmatpush3.bf16.msra.mxu0 %v689_v8  ;;  %722 = vmatprep.subr.bf16.mxu1 %v721_v23  ;;  %v247_v50 = vld [vmem:[#allocation13 + $0x78] sm:$0xff]  ;;  %v745_v51 = vpack.c.bf16 %v332_v47, %v331_v46  ;;  %v333_v52 = vld [vmem:[#allocation14 + $0x10] sm:$0xff]  ;;  %v335_v58 = vld [vmem:[#allocation14 + $0x20] sm:$0xff] }
  0x7a   :  { %694 = vmatprep.subr.bf16.mxu0 %v693_v19  ;;  %v334_v53 = vld [vmem:[#allocation14 + $0x18] sm:$0xff]  ;;  %v741_v54 = vpack.c.bf16 %v247_v50, %v246_v49  ;;  %v329_v57 = vld [vmem:[#allocation10] sm:$0xff]  ;;  %v336_v59 = vld [vmem:[#allocation14 + $0x28] sm:$0xff] }
  0x7b   :  { %v132_v55 = vld [vmem:[#allocation5 + $0x8] sm:$0xff]  ;;  %v749_v56 = vpack.c.bf16 %v334_v53, %v333_v52  ;;  %v753_v60 = vpack.c.bf16 %v336_v59, %v335_v58  ;;  %v231_v61 = vld [vmem:[#allocation8 + $0x8] sm:$0xff]  ;;  %v337_v62 = vld [vmem:[#allocation14 + $0x30] sm:$0xff] }
  0x7c   :  { %724 = vmatpush3.bf16.msra.mxu1 %v721_v23  ;;  %v338_v63 = vld [vmem:[#allocation14 + $0x38] sm:$0xff]  ;;  %v339_v1 = vld [vmem:[#allocation14 + $0x40] sm:$0xff]  ;;  %v340_v2 = vld [vmem:[#allocation14 + $0x48] sm:$0xff] }
  0x7d   :  { %696 = vmatpush3.bf16.msra.mxu0 %v693_v19  ;;  %726 = vmatprep.subr.bf16.mxu1 %v725_v29  ;;  %v757_v0 = vpack.c.bf16 %v338_v63, %v337_v62  ;;  %v761_v3 = vpack.c.bf16 %v340_v2, %v339_v1  ;;  %v341_v4 = vld [vmem:[#allocation14 + $0x50] sm:$0xff]  ;;  %v342_v5 = vld [vmem:[#allocation14 + $0x58] sm:$0xff]  ;;  %v343_v7 = vld [vmem:[#allocation14 + $0x60] sm:$0xff] }
  0x7e   :  { %698 = vmatprep.subr.bf16.mxu0 %v697_v26  ;;  %v765_v6 = vpack.c.bf16 %v342_v5, %v341_v4  ;;  %v344_v8 = vld [vmem:[#allocation14 + $0x68] sm:$0xff]  ;;  %v345_v10 = vld [vmem:[#allocation14 + $0x70] sm:$0xff]  ;;  %v346_v11 = vld [vmem:[#allocation14 + $0x78] sm:$0xff] }
  0x7f   :  { %v769_v9 = vpack.c.bf16 %v344_v8, %v343_v7  ;;  %v773_v12 = vpack.c.bf16 %v346_v11, %v345_v10  ;;  %v330_v13 = vld [vmem:[#allocation10 + $0x8] sm:$0xff]  ;;  %v519_v14 = vld [vmem:[%s1240_s6] ss:$0 sm:$0xff] }
  0x80   :  { %728 = vmatpush3.bf16.msra.mxu1 %v725_v29  ;;  %v520_v19 = vld [vmem:[%s1241_s7] ss:$0 sm:$0xff] }
  0x81   :  { %700 = vmatpush3.bf16.msra.mxu0 %v697_v26  ;;  %730 = vmatprep.subr.bf16.mxu1 %v729_v36 }
  0x82   :  { %702 = vmatprep.subr.bf16.mxu0 %v701_v33 }
  0x84   :  { %732 = vmatpush3.bf16.msra.mxu1 %v729_v36 }
  0x85   :  { %704 = vmatpush3.bf16.msra.mxu0 %v701_v33  ;;  %734 = vmatprep.subr.bf16.mxu1 %v733_v42 }
  0x86   :  { %706 = vmatprep.subr.bf16.mxu0 %v705_v39 }
  0x88   :  { %736 = vmatpush3.bf16.msra.mxu1 %v733_v42 }
  0x89   :  { %708 = vmatpush3.bf16.msra.mxu0 %v705_v39  ;;  %738 = vmatprep.subr.bf16.mxu1 %v737_v48 }
  0x8a   :  { %710 = vmatprep.subr.bf16.mxu0 %v709_v45 }
  0x8c   :  { %740 = vmatpush3.bf16.msra.mxu1 %v737_v48 }
  0x8d   :  { %712 = vmatpush3.bf16.msra.mxu0 %v709_v45  ;;  %742 = vmatprep.subr.bf16.mxu1 %v741_v54 }
  0x8e   :  { %746 = vmatprep.subr.bf16.mxu0 %v745_v51 }
  0x90   :  { %609 = vmatmul.mubr.f32.vlgmr.msra.gmra.mrb[0].mxu0 %v132_v55  ;;  %744 = vmatpush3.bf16.msra.mxu1 %v741_v54 }
  0x91   :  { %748 = vmatpush3.bf16.msra.mxu0 %v745_v51  ;;  %678 = vmatprep.mubr.f32.mxu0 %v329_v57 }
  0x92   :  { %750 = vmatprep.subr.bf16.mxu0 %v749_v56 }
  0x93   :  { %644 = vmatmul.mubr.f32.vlgmr.msra.gmra.mrb[0].mxu1 %v231_v61 }
  0x95   :  { %752 = vmatpush3.bf16.msra.mxu0 %v749_v56 }
  0x96   :  { %754 = vmatprep.subr.bf16.mxu0 %v753_v60 }
  0x99   :  { %756 = vmatpush3.bf16.msra.mxu0 %v753_v60 }
  0x9a   :  { %758 = vmatprep.subr.bf16.mxu0 %v757_v0 }
  0x9d   :  { %760 = vmatpush3.bf16.msra.mxu0 %v757_v0 }
  0x9e   :  { %762 = vmatprep.subr.bf16.mxu0 %v761_v3 }
  0xa1   :  { %764 = vmatpush3.bf16.msra.mxu0 %v761_v3 }
  0xa2   :  { %766 = vmatprep.subr.bf16.mxu0 %v765_v6 }
  0xa5   :  { %768 = vmatpush3.bf16.msra.mxu0 %v765_v6 }
  0xa6   :  { %770 = vmatprep.subr.bf16.mxu0 %v769_v9 }
  0xa9   :  { %772 = vmatpush3.bf16.msra.mxu0 %v769_v9 }
  0xaa   :  { %774 = vmatprep.subr.bf16.mxu0 %v773_v12 }
  0xad   :  { %776 = vmatpush3.bf16.msra.mxu0 %v773_v12 }
  0xb0   :  { %679 = vmatmul.mubr.f32.vlgmr.msra.gmra.mrb[2].mxu0 %v330_v13 }
 0x163   :  { %v610_v15 = vpop.f32.mrb[0].mxu0 }
 0x164   :  { %v439_v16 = vadd.f32 %v610_v15, %v519_v14  ;;  %v215_v17 = vpop.f32.mrb[1].mxu0 }
 0x165   :  { %v438_v18 = vadd.f32 %v519_v14, %v215_v17 }
 0x166   :  { %441 = vst [vmem:[#allocation16 + $0x8] sm:$0xff] %v439_v16  ;;  %v645_v20 = vpop.f32.mrb[0].mxu1 }
 0x167   :  { %440 = vst [vmem:[#allocation16] sm:$0xff] %v438_v18 }
 0x168   :  { %931 = shalt.err (!%p928_p10)
}
 0x169   :  { %s932_s2 = scalar_lea.hbm %s1243_s9, 256 }
 0x16a   :  { %p933_p11 = scmp.ne.s32.totalorder %s1243_s9, %s932_s2  ;;  %p936_p12 = scmp.lt.u32.totalorder %s932_s2, %s1243_s9 }
 0x16c   :  { %p938_p13 = pnand %p936_p12, %p933_p11 }
 0x16e   :  { %941 = shalt.err (!%p938_p13)
}
 0x16f   :  { %479 = dma.vmem_to_hbm [thread:$0]  %s474_s16, 256, %s1243_s9, [#allocation7], %s1000_s29, %s1000_s29, %s1001_s30   ;;  %v452_v21 = vadd.f32 %v645_v20, %v520_v19  ;;  %v314_v22 = vpop.f32.mrb[1].mxu1 }
 0x170   :  { %v451_v23 = vadd.f32 %v520_v19, %v314_v22  ;;  %s942_s26 = scalar_lea.vmem %s486_s19, 256  ;;  %p947_p1 = scmp.lt.s32.totalorder %s486_s19, %s486_s19 }
 0x171   :  { %454 = vst [vmem:[#allocation17 + $0x8] sm:$0xff] %v452_v21  ;;  %p943_p0 = scmp.ne.s32.totalorder %s486_s19, %s942_s26  ;;  %p948_p2 = scmp.lt.s32.totalorder %s942_s26, %s942_s26 }
 0x172   :  { %453 = vst [vmem:[#allocation17] sm:$0xff] %v451_v23 }
 0x173   :  { %p949_p3 = por %p948_p2, %p947_p1 }
 0x175   :  { %p950_p4 = pnand %p949_p3, %p943_p0 }
 0x177   :  { %953 = shalt.err (!%p950_p4)
}
 0x178   :  { %s954_s25 = scalar_lea.hbm %s1244_s10, 256 }
 0x179   :  { %p955_p5 = scmp.ne.s32.totalorder %s1244_s10, %s954_s25  ;;  %p958_p6 = scmp.lt.u32.totalorder %s954_s25, %s1244_s10 }
 0x17b   :  { %p960_p7 = pnand %p958_p6, %p955_p5 }
 0x17d   :  { %963 = shalt.err (!%p960_p7)
}
 0x17e   :  { %491 = dma.vmem_to_hbm [thread:$0]  %s486_s19, 256, %s1244_s10, [#allocation18], %s1000_s29, %s1000_s29, %s1001_s30  }
 0x17f   :  { %v521_v24 = vld [vmem:[%s1242_s8] ss:$0 sm:$0xff]  ;;  %s1008_s17 = smov [#allocation19]  }
 0x180   :  { %s497_s3 = sshll.u32 %s1008_s17, 4  ;;  %s498_s3 = int_to_ptr.vmem [resolvable:$true] %s497_s3 }
 0x181   :  { %s964_s20 = scalar_lea.vmem %s498_s3, 256  ;;  %p969_p9 = scmp.lt.s32.totalorder %s498_s3, %s498_s3 }
 0x182   :  { %p965_p8 = scmp.ne.s32.totalorder %s498_s3, %s964_s20  ;;  %p970_p10 = scmp.lt.s32.totalorder %s964_s20, %s964_s20 }
 0x183   :  { %v680_v25 = vpop.f32.mrb[2].mxu0 }
 0x184   :  { %v465_v26 = vadd.f32 %v680_v25, %v521_v24  ;;  %v413_v27 = vpop.f32.mrb[3].mxu0  ;;  %p971_p11 = por %p970_p10, %p969_p9 }
 0x185   :  { %v464_v28 = vadd.f32 %v521_v24, %v413_v27 }
 0x186   :  { %467 = vst [vmem:[#allocation19 + $0x8] sm:$0xff] %v465_v26  ;;  %p972_p12 = pnand %p971_p11, %p965_p8 }
 0x187   :  { %466 = vst [vmem:[#allocation19] sm:$0xff] %v464_v28 }
 0x188   :  { %975 = shalt.err (!%p972_p12)
}
 0x189   :  { %s976_s8 = scalar_lea.hbm %s1245_s11, 256 }
 0x18a   :  { %p977_p13 = scmp.ne.s32.totalorder %s1245_s11, %s976_s8  ;;  %p980_p0 = scmp.lt.u32.totalorder %s976_s8, %s1245_s11 }
 0x18c   :  { %p982_p1 = pnand %p980_p0, %p977_p13 }
 0x18e   :  { %985 = shalt.err (!%p982_p1)
}
 0x18f   :  { %503 = dma.vmem_to_hbm [thread:$0]  %s498_s3, 256, %s1245_s11, [#allocation18], %s1000_s29, %s1000_s29, %s1001_s30  }
 0x190   :  { %994 = dma.done.wait [#allocation7], 256  }
 0x191   :  { %995 = vsyncadd [#allocation7], 4294967040 }
 0x192   :  { %996 = dma.done.wait [#allocation18], 512  }
 0x193   :  { %997 = vsyncadd [#allocation18], 4294966784 }
 0x194   :  { %513 = vsyncpa [#allocation6], 1 }
 0x195   :  { %514 = vsyncpa [#allocation9], 1 }
 0x196   :  { %515 = vsyncpa [#allocation12], 1 }
 0x197   :  { %516 = vsyncpa [#allocation15], 1 }
 0x198   :  { %517 = vsyncpa [#allocation7], 1 }
 0x199   :  { %518 = vsyncpa [#allocation18], 1 }

</bundles_post_ra>
